<compile_context>
chip_gen: v7x
topology: tpu7x:2x2x1
jax: 0.10.0
libtpu: 0.0.40
codegen_flags: <defaults>
</compile_context>

<pallas_src>
import jax
import jax.numpy as jnp
from jax.experimental import pallas as pl
from jax.experimental.pallas import tpu as pltpu

LN_EPS = 1e-5  # PyTorch LayerNorm default eps


def _make_kernel(L, L_TILE, B_TILE):
    need_mask = (L % L_TILE) != 0
    inv_L = 1.0 / float(L)

    def kernel(x_ref, w1_ref, w2_ref, gamma_ref, beta_ref, o_ref, sum_ref, max_ref):
        # x_ref: (B_TILE, C, L_TILE)   w1_ref: (C, H)   w2_ref: (H, C)
        # gamma_ref/beta_ref: (1, C)   o_ref: (B_TILE, C)
        # sum_ref/max_ref: (B_TILE, C) f32 running accumulators (VMEM scratch)
        l = pl.program_id(1)

        @pl.when(l == 0)
        def _init():
            sum_ref[...] = jnp.zeros_like(sum_ref)
            max_ref[...] = jnp.full_like(max_ref, -jnp.inf)

        xt = x_ref[...].astype(jnp.float32)  # (B_TILE, C, L_TILE)

        if need_mask:
            # Mask out-of-bounds lanes of the (possibly partial) last L tile.
            lane = jax.lax.broadcasted_iota(jnp.int32, (1, 1, L_TILE), 2)
            valid = (l * L_TILE + lane) < L
            x_sum = jnp.where(valid, xt, 0.0)
            x_max = jnp.where(valid, xt, -jnp.inf)
        else:
            x_sum = xt
            x_max = xt

        # Streaming reductions over the L (lane) axis.
        sum_ref[...] += jnp.sum(x_sum, axis=-1)
        max_ref[...] = jnp.maximum(max_ref[...], jnp.max(x_max, axis=-1))

        # Epilogue only on the final L step: tiny MLP + LayerNorm + sigmoid.
        @pl.when(l == pl.num_programs(1) - 1)
        def _finalize():
            avg = sum_ref[...] * inv_L          # true-L mean, (B_TILE, C)
            mx = max_ref[...]                   # (B_TILE, C)

            w1t = w1_ref[...].astype(jnp.float32)  # (C, H)  (pre-transposed)
            w2t = w2_ref[...].astype(jnp.float32)  # (H, C)  (pre-transposed)

            # Fused branches: one matmul pair over the stacked (2*B_TILE, C) operand.
            p = jnp.concatenate([avg, mx], axis=0)                       # (2B, C)
            h = jnp.maximum(
                jnp.dot(p, w1t, preferred_element_type=jnp.float32), 0.0)  # (2B, H)
            y = jnp.dot(h, w2t, preferred_element_type=jnp.float32)         # (2B, C)
            out = y[:B_TILE] + y[B_TILE:]                                    # (B, C)

            # LayerNorm over the channel dimension.
            mean = jnp.mean(out, axis=-1, keepdims=True)
            var = jnp.mean((out - mean) ** 2, axis=-1, keepdims=True)
            normed = (out - mean) * jax.lax.rsqrt(var + LN_EPS)
            normed = normed * gamma_ref[...] + beta_ref[...]

            o_ref[...] = jax.nn.sigmoid(normed).astype(o_ref.dtype)

    return kernel


def channel_attention(x, w1, w2, gamma, beta, *, b_tile=None, l_tile=None):
    """x: (B, C, L). w1: (H, C), w2: (C, H) (Conv1d weights, k-size axis squeezed).
    Returns (B, C, 1) float32."""
    B, C, L = x.shape
    H = w1.shape[0]
    assert w1.shape == (H, C) and w2.shape == (C, H)

    # --- tile selection -------------------------------------------------------
    B_TILE = b_tile if b_tile is not None else min(B, 8)
    if l_tile is not None:
        L_TILE = l_tile
    elif L <= 2048:
        L_TILE = L  # single L step; block equals full dim (satisfies layout rule)
    else:
        L_TILE = 2048  # multiple of 128
        # Keep the streamed (double-buffered) x tile within a modest VMEM budget,
        # safe even on v7x's smaller 64 MiB VMEM / 32 MiB scoped default.
        while B_TILE * C * L_TILE * x.dtype.itemsize > (8 << 20) and L_TILE > 128:
            L_TILE //= 2

    grid = (pl.cdiv(B, B_TILE), pl.cdiv(L, L_TILE))

    # Pre-transpose weights in the wrapper (free layout plumbing, no in-kernel .T).
    w1t = jnp.asarray(w1).T          # (C, H)
    w2t = jnp.asarray(w2).T          # (H, C)
    gamma2 = jnp.asarray(gamma).reshape(1, C)
    beta2 = jnp.asarray(beta).reshape(1, C)

    itemsize = x.dtype.itemsize
    cost = pl.CostEstimate(
        flops=int(2 * B * C * L + 8 * B * C * H + 12 * B * C),
        transcendentals=int(B * C + B),
        bytes_accessed=int(B * C * L * itemsize + (2 * C * H + 2 * C) * 4 + B * C * 4),
    )

    out = pl.pallas_call(
        _make_kernel(L, L_TILE, B_TILE),
        out_shape=jax.ShapeDtypeStruct((B, C), jnp.float32),
        grid=grid,
        in_specs=[
            # Streamed input: (B_TILE, C, L_TILE) tiles, auto-pipelined.
            pl.BlockSpec((B_TILE, C, L_TILE), lambda b, l: (b, 0, l)),
            # Weights / affine params: constant index_map -> VMEM-resident.
            pl.BlockSpec((C, H), lambda b, l: (0, 0)),
            pl.BlockSpec((H, C), lambda b, l: (0, 0)),
            pl.BlockSpec((1, C), lambda b, l: (0, 0)),
            pl.BlockSpec((1, C), lambda b, l: (0, 0)),
        ],
        out_specs=pl.BlockSpec((B_TILE, C), lambda b, l: (b, 0)),
        scratch_shapes=[
            pltpu.VMEM((B_TILE, C), jnp.float32),  # running sum
            pltpu.VMEM((B_TILE, C), jnp.float32),  # running max
        ],
        compiler_params=pltpu.CompilerParams(
            dimension_semantics=("parallel", "arbitrary")),
        cost_estimate=cost,
    )(x, w1t, w2t, gamma2, beta2)

    return out[..., None]  # unsqueeze(-1) -> (B, C, 1)


def channel_attention_ref(x, w1, w2, gamma, beta):
    """Pure-JAX reference matching the PyTorch forward."""
    avg = jnp.mean(x, axis=-1)
    mx = jnp.max(x, axis=-1)

    def mlp(p):
        h = jnp.maximum(p @ w1.T, 0.0)
        return h @ w2.T

    out = mlp(avg) + mlp(mx)
    mean = jnp.mean(out, axis=-1, keepdims=True)
    var = jnp.mean((out - mean) ** 2, axis=-1, keepdims=True)
    normed = (out - mean) / jnp.sqrt(var + LN_EPS)
    normed = normed * gamma + beta
    return jax.nn.sigmoid(normed)[..., None]


if __name__ == "__main__":
    # Shapes consistent with the module: in_planes=32, ratio=16 -> hidden=2.
    B, C, ratio = 2, 32, 16
    H = C // ratio

    key = jax.random.PRNGKey(0)
    kx, k1, k2, kg, kb, kx2 = jax.random.split(key, 6)

    # Conv1d weights (out_ch, in_ch, 1) with the kernel-size-1 axis squeezed out.
    w1 = jax.random.normal(k1, (H, C), dtype=jnp.float32) * 0.1   # fc1 weight
    w2 = jax.random.normal(k2, (C, H), dtype=jnp.float32) * 0.1   # fc2 weight
    gamma = 1.0 + 0.05 * jax.random.normal(kg, (C,), dtype=jnp.float32)
    beta = 0.05 * jax.random.normal(kb, (C,), dtype=jnp.float32)

    # Test 1: small L — single L step (block equals full dims).
    L1 = 16
    x1 = jax.random.normal(kx, (B, C, L1), dtype=jnp.float32)
    y1 = channel_attention(x1, w1, w2, gamma, beta)
    jax.block_until_ready(y1)
    y1_ref = channel_attention_ref(x1, w1, w2, gamma, beta)
    assert y1.shape == (B, C, 1)
    assert jnp.allclose(y1, y1_ref, atol=1e-5, rtol=1e-5), "mismatch (single-tile path)"

    # Test 2: exercise the tiled-L accumulator path with a partial last tile
    # (L=160, L_TILE=128 -> 2 L steps, last one masked).
    L2 = 160
    x2 = jax.random.normal(kx2, (B, C, L2), dtype=jnp.float32)
    y2 = channel_attention(x2, w1, w2, gamma, beta, l_tile=128)
    jax.block_until_ready(y2)
    y2_ref = channel_attention_ref(x2, w1, w2, gamma, beta)
    assert y2.shape == (B, C, 1)
    assert jnp.allclose(y2, y2_ref, atol=1e-5, rtol=1e-5), "mismatch (tiled-L path)"

    # NOTE: for B == 1, PyTorch `.squeeze()` would give (C,) -> output (C, 1);
    # this wrapper always returns (B, C, 1), i.e. the B > 1 behavior.
    print("KERNEL_OK")
</pallas_src>

<mosaic_0001>
module attributes {stable_mosaic.version = 11 : i64} {
  func.func @kernel(%arg0: i32, %arg1: i32, %arg2: memref<2x32x16xf32, #tpu.memory_space<vmem>>, %arg3: memref<32x2xf32, #tpu.memory_space<vmem>>, %arg4: memref<2x32xf32, #tpu.memory_space<vmem>>, %arg5: memref<1x32xf32, #tpu.memory_space<vmem>>, %arg6: memref<1x32xf32, #tpu.memory_space<vmem>>, %arg7: memref<2x32xf32, #tpu.memory_space<vmem>>, %arg8: memref<2x32xf32, #tpu.memory_space<vmem>>, %arg9: memref<2x32xf32, #tpu.memory_space<vmem>>) attributes {dimension_semantics = [#tpu.dimension_semantics<parallel>, #tpu.dimension_semantics<arbitrary>], iteration_bounds = array<i64: 1, 1>, scalar_prefetch = 0 : i64, scratch_operands = 2 : i64, tpu.core_type = #tpu.core_type<tc>, window_params = [{transform_indices = @transform_0, window_bounds = array<i64: 2, 32, 16>}, {pipeline_mode = #tpu.pipeline_mode<synchronous>, transform_indices = @transform_1, window_bounds = array<i64: 32, 2>}, {pipeline_mode = #tpu.pipeline_mode<synchronous>, transform_indices = @transform_2, window_bounds = array<i64: 2, 32>}, {pipeline_mode = #tpu.pipeline_mode<synchronous>, transform_indices = @transform_3, window_bounds = array<i64: 1, 32>}, {pipeline_mode = #tpu.pipeline_mode<synchronous>, transform_indices = @transform_4, window_bounds = array<i64: 1, 32>}, {transform_indices = @transform_5, window_bounds = array<i64: 2, 32>}]} {
    %c0_i32 = arith.constant 0 : i32
    %0 = arith.cmpi eq, %arg1, %c0_i32 : i32
    %1 = arith.extui %0 : i1 to i32
    %c0_i32_0 = arith.constant 0 : i32
    %2 = arith.cmpi ne, %1, %c0_i32_0 : i32
    scf.if %2 {
      %cst_14 = arith.constant 0.000000e+00 : f32
      %15 = vector.broadcast %cst_14 : f32 to vector<2x32xf32>
      %c0_15 = arith.constant 0 : index
      %c0_16 = arith.constant 0 : index
      %16 = vector.load %arg8[%c0_15, %c0_16] : memref<2x32xf32, #tpu.memory_space<vmem>>, vector<2x32xf32>
      tpu.vector_store %arg8[%c0_15, %c0_16], %15 {strides = array<i32>} : memref<2x32xf32, #tpu.memory_space<vmem>>, vector<2x32xf32>,
      %cst_17 = arith.constant 0xFF800000 : f32
      %17 = vector.broadcast %cst_17 : f32 to vector<2x32xf32>
      %c0_18 = arith.constant 0 : index
      %c0_19 = arith.constant 0 : index
      %18 = vector.load %arg9[%c0_18, %c0_19] : memref<2x32xf32, #tpu.memory_space<vmem>>, vector<2x32xf32>
      tpu.vector_store %arg9[%c0_18, %c0_19], %17 {strides = array<i32>} : memref<2x32xf32, #tpu.memory_space<vmem>>, vector<2x32xf32>,
    } else {
    }
    %c0 = arith.constant 0 : index
    %c0_1 = arith.constant 0 : index
    %c0_2 = arith.constant 0 : index
    %3 = vector.load %arg2[%c0, %c0_1, %c0_2] : memref<2x32x16xf32, #tpu.memory_space<vmem>>, vector<2x32x16xf32>
    %c0_3 = arith.constant 0 : index
    %c0_4 = arith.constant 0 : index
    %4 = vector.load %arg8[%c0_3, %c0_4] : memref<2x32xf32, #tpu.memory_space<vmem>>, vector<2x32xf32>
    %cst = arith.constant dense<0.000000e+00> : vector<2x32xf32>
    %5 = vector.multi_reduction <add>, %3, %cst [2] : vector<2x32x16xf32> to vector<2x32xf32>
    %6 = arith.addf %4, %5 : vector<2x32xf32>
    %c0_5 = arith.constant 0 : index
    %c0_6 = arith.constant 0 : index
    %7 = vector.load %arg8[%c0_5, %c0_6] : memref<2x32xf32, #tpu.memory_space<vmem>>, vector<2x32xf32>
    tpu.vector_store %arg8[%c0_5, %c0_6], %6 {strides = array<i32>} : memref<2x32xf32, #tpu.memory_space<vmem>>, vector<2x32xf32>,
    %c0_7 = arith.constant 0 : index
    %c0_8 = arith.constant 0 : index
    %8 = vector.load %arg9[%c0_7, %c0_8] : memref<2x32xf32, #tpu.memory_space<vmem>>, vector<2x32xf32>
    %cst_9 = arith.constant dense<0xFF800000> : vector<2x32xf32>
    %9 = vector.multi_reduction <maximumf>, %3, %cst_9 [2] : vector<2x32x16xf32> to vector<2x32xf32>
    %10 = arith.maximumf %8, %9 : vector<2x32xf32>
    %c0_10 = arith.constant 0 : index
    %c0_11 = arith.constant 0 : index
    %11 = vector.load %arg9[%c0_10, %c0_11] : memref<2x32xf32, #tpu.memory_space<vmem>>, vector<2x32xf32>
    tpu.vector_store %arg9[%c0_10, %c0_11], %10 {strides = array<i32>} : memref<2x32xf32, #tpu.memory_space<vmem>>, vector<2x32xf32>,
    %c0_i32_12 = arith.constant 0 : i32
    %12 = arith.cmpi eq, %arg1, %c0_i32_12 : i32
    %13 = arith.extui %12 : i1 to i32
    %c0_i32_13 = arith.constant 0 : i32
    %14 = arith.cmpi ne, %13, %c0_i32_13 : i32
    scf.if %14 {
      %c0_14 = arith.constant 0 : index
      %c0_15 = arith.constant 0 : index
      %15 = vector.load %arg8[%c0_14, %c0_15] : memref<2x32xf32, #tpu.memory_space<vmem>>, vector<2x32xf32>
      %cst_16 = arith.constant 6.250000e-02 : f32
      %16 = vector.broadcast %cst_16 : f32 to vector<2x32xf32>
      %17 = arith.mulf %15, %16 : vector<2x32xf32>
      %c0_17 = arith.constant 0 : index
      %c0_18 = arith.constant 0 : index
      %18 = vector.load %arg9[%c0_17, %c0_18] : memref<2x32xf32, #tpu.memory_space<vmem>>, vector<2x32xf32>
      %c0_19 = arith.constant 0 : index
      %c0_20 = arith.constant 0 : index
      %19 = vector.load %arg3[%c0_19, %c0_20] : memref<32x2xf32, #tpu.memory_space<vmem>>, vector<32x2xf32>
      %c0_21 = arith.constant 0 : index
      %c0_22 = arith.constant 0 : index
      %20 = vector.load %arg4[%c0_21, %c0_22] : memref<2x32xf32, #tpu.memory_space<vmem>>, vector<2x32xf32>
      %21 = tpu.concatenate %17, %18 in 0 : vector<2x32xf32>, vector<2x32xf32> -> vector<4x32xf32>
      %cst_23 = arith.constant dense<0.000000e+00> : vector<4x2xf32>
      %22 = tpu.matmul %21, %19, %cst_23 {dimension_numbers = #tpu.dot_dimension_numbers<[1], [0], [0], [1], [0, 0, 1, 1], [], []>} : vector<4x32xf32>, vector<32x2xf32>, vector<4x2xf32> -> vector<4x2xf32>
      %cst_24 = arith.constant 0.000000e+00 : f32
      %23 = vector.broadcast %cst_24 : f32 to vector<4x2xf32>
      %24 = arith.maximumf %22, %23 : vector<4x2xf32>
      %cst_25 = arith.constant dense<0.000000e+00> : vector<4x32xf32>
      %25 = tpu.matmul %24, %20, %cst_25 {dimension_numbers = #tpu.dot_dimension_numbers<[1], [0], [0], [1], [0, 0, 1, 1], [], []>} : vector<4x2xf32>, vector<2x32xf32>, vector<4x32xf32> -> vector<4x32xf32>
      %26 = vector.extract_strided_slice %25 {offsets = [0, 0], sizes = [2, 32], strides = [1, 1]} : vector<4x32xf32> to vector<2x32xf32>
      %27 = vector.extract_strided_slice %25 {offsets = [2, 0], sizes = [2, 32], strides = [1, 1]} : vector<4x32xf32> to vector<2x32xf32>
      %28 = arith.addf %26, %27 : vector<2x32xf32>
      %cst_26 = arith.constant dense<0.000000e+00> : vector<2xf32>
      %29 = vector.multi_reduction <add>, %28, %cst_26 [1] : vector<2x32xf32> to vector<2xf32>
      %30 = vector.shape_cast %29 : vector<2xf32> to vector<2x1xf32>
      %cst_27 = arith.constant 3.200000e+01 : f32
      %31 = vector.broadcast %cst_27 : f32 to vector<2x1xf32>
      %32 = arith.divf %30, %31 : vector<2x1xf32>
      %33 = vector.broadcast %32 : vector<2x1xf32> to vector<2x32xf32>
      %34 = arith.subf %28, %33 : vector<2x32xf32>
      %35 = arith.mulf %34, %34 : vector<2x32xf32>
      %cst_28 = arith.constant dense<0.000000e+00> : vector<2xf32>
      %36 = vector.multi_reduction <add>, %35, %cst_28 [1] : vector<2x32xf32> to vector<2xf32>
      %37 = vector.shape_cast %36 : vector<2xf32> to vector<2x1xf32>
      %cst_29 = arith.constant 3.200000e+01 : f32
      %38 = vector.broadcast %cst_29 : f32 to vector<2x1xf32>
      %39 = arith.divf %37, %38 : vector<2x1xf32>
      %40 = vector.broadcast %32 : vector<2x1xf32> to vector<2x32xf32>
      %41 = arith.subf %28, %40 : vector<2x32xf32>
      %cst_30 = arith.constant 9.99999974E-6 : f32
      %42 = vector.broadcast %cst_30 : f32 to vector<2x1xf32>
      %43 = arith.addf %39, %42 : vector<2x1xf32>
      %44 = math.rsqrt %43 : vector<2x1xf32>
      %45 = vector.broadcast %44 : vector<2x1xf32> to vector<2x32xf32>
      %46 = arith.mulf %41, %45 : vector<2x32xf32>
      %c0_31 = arith.constant 0 : index
      %c0_32 = arith.constant 0 : index
      %47 = vector.load %arg5[%c0_31, %c0_32] : memref<1x32xf32, #tpu.memory_space<vmem>>, vector<1x32xf32>
      %48 = vector.broadcast %47 : vector<1x32xf32> to vector<2x32xf32>
      %49 = arith.mulf %46, %48 : vector<2x32xf32>
      %c0_33 = arith.constant 0 : index
      %c0_34 = arith.constant 0 : index
      %50 = vector.load %arg6[%c0_33, %c0_34] : memref<1x32xf32, #tpu.memory_space<vmem>>, vector<1x32xf32>
      %51 = vector.broadcast %50 : vector<1x32xf32> to vector<2x32xf32>
      %52 = arith.addf %49, %51 : vector<2x32xf32>
      %53 = arith.negf %52 : vector<2x32xf32>
      %54 = math.exp %53 : vector<2x32xf32>
      %cst_35 = arith.constant 1.000000e+00 : f32
      %55 = vector.broadcast %cst_35 : f32 to vector<2x32xf32>
      %56 = arith.addf %55, %54 : vector<2x32xf32>
      %57 = arith.divf %55, %56 : vector<2x32xf32>
      %c0_36 = arith.constant 0 : index
      %c0_37 = arith.constant 0 : index
      %58 = vector.load %arg7[%c0_36, %c0_37] : memref<2x32xf32, #tpu.memory_space<vmem>>, vector<2x32xf32>
      tpu.vector_store %arg7[%c0_36, %c0_37], %57 {strides = array<i32>} : memref<2x32xf32, #tpu.memory_space<vmem>>, vector<2x32xf32>,
    } else {
    }
    return
  }
  func.func @transform_0(%arg0: i32, %arg1: i32) -> (i32, i32, i32) {
    %c0_i32 = arith.constant 0 : i32
    %c0_i32_0 = arith.constant 0 : i32
    return %arg0, %c0_i32, %arg1 : i32, i32, i32
  }
  func.func @transform_1(%arg0: i32, %arg1: i32) -> (i32, i32) {
    %c0_i32 = arith.constant 0 : i32
    %c0_i32_0 = arith.constant 0 : i32
    %c0_i32_1 = arith.constant 0 : i32
    return %c0_i32, %c0_i32_0 : i32, i32
  }
  func.func @transform_2(%arg0: i32, %arg1: i32) -> (i32, i32) {
    %c0_i32 = arith.constant 0 : i32
    %c0_i32_0 = arith.constant 0 : i32
    %c0_i32_1 = arith.constant 0 : i32
    return %c0_i32, %c0_i32_0 : i32, i32
  }
  func.func @transform_3(%arg0: i32, %arg1: i32) -> (i32, i32) {
    %c0_i32 = arith.constant 0 : i32
    %c0_i32_0 = arith.constant 0 : i32
    %c0_i32_1 = arith.constant 0 : i32
    return %c0_i32, %c0_i32_0 : i32, i32
  }
  func.func @transform_4(%arg0: i32, %arg1: i32) -> (i32, i32) {
    %c0_i32 = arith.constant 0 : i32
    %c0_i32_0 = arith.constant 0 : i32
    %c0_i32_1 = arith.constant 0 : i32
    return %c0_i32, %c0_i32_0 : i32, i32
  }
  func.func @transform_5(%arg0: i32, %arg1: i32) -> (i32, i32) {
    %c0_i32 = arith.constant 0 : i32
    %c0_i32_0 = arith.constant 0 : i32
    return %arg0, %c0_i32 : i32, i32
  }
}

</mosaic_0001>

<bundles_post_ra>
// kernel: tpu_custom_call.1
= control target key start
LH: loop header
LB: loop body
LE: loop exit
PB: predicated region body
PF: predicated region fallthrough
CT: control target
= control target key end

     0   :  { %vm37_vm0 = vcmask 130048   ;;  %s619_s0 = inlined_call_operand.vmem [shape: f32[2,32,16], index: 0, kind: input, shape index: {}]   ;;  %s620_s1 = inlined_call_operand.vmem [shape: f32[32,2], index: 1, kind: input, shape index: {}]   ;;  %s621_s2 = inlined_call_operand.vmem [shape: f32[2,32], index: 2, kind: input, shape index: {}]   ;;  %s622_s3 = inlined_call_operand.vmem [shape: f32[1,32], index: 3, kind: input, shape index: {}]   ;;  %s623_s4 = inlined_call_operand.vmem [shape: f32[1,32], index: 4, kind: input, shape index: {}]   ;;  %s624_s5 = inlined_call_operand.hbm [shape: f32[2,32], index: 5, kind: output, shape index: {}]  }
   0x1   :  { %v32_v0 = vld [vmem:[%s619_s0 + $0x20] sm:$0xff]  ;;  %v33_v2 = vld [vmem:[%s619_s0 + $0x28] sm:$0xff] }
   0x2   :  { %v28_v1 = vld [vmem:[%s619_s0] sm:$0xff]  ;;  %v50_v3 = vsel %vm37_vm0, %v32_v0, 0.0  ;;  %v29_v5 = vld [vmem:[%s619_s0 + $0x8] sm:$0xff]  ;;  %v53_v6 = vsel %vm37_vm0, %v33_v2, 0.0 }
   0x3   :  { %v38_v4 = vsel %vm37_vm0, %v28_v1, 0.0  ;;  %51 = vadd.xlane.f32.xlu1 %v50_v3  ;;  %v41_v7 = vsel %vm37_vm0, %v29_v5, 0.0 }
   0x4   :  { %39 = vadd.xlane.f32.xlu0 %v38_v4 }
   0x5   :  { %10 = vsyncpa [#allocation5], 0  ;;  %v126_v8 = vsel %vm37_vm0, %v29_v5, -inf  ;;  %v123_v9 = vsel %vm37_vm0, %v28_v1, -inf  ;;  %v138_v10 = vsel %vm37_vm0, %v33_v2, -inf  ;;  %v135_v11 = vsel %vm37_vm0, %v32_v0, -inf }
   0x6   :  { %v34_v12 = vld [vmem:[%s619_s0 + $0x30] sm:$0xff]  ;;  %v35_v18 = vld [vmem:[%s619_s0 + $0x38] sm:$0xff]  ;;  %vm25_vm1 = vcmask 254976   ;;  %v490_v24 = vmov 0.0   ;;  %v491_v25 = vmov -inf   ;;  %v203_v26 = vld [vmem:[%s620_s1] sm:$0xff]  ;;  %v70_v37 = vlaneseq }
   0x7   :  { %54 = vadd.xlane.f32.xlu1 %v53_v6  ;;  %v30_v13 = vld [vmem:[%s619_s0 + $0x10] sm:$0xff]  ;;  %v56_v14 = vsel %vm37_vm0, %v34_v12, 0.0  ;;  %v141_v16 = vsel %vm37_vm0, %v34_v12, -inf  ;;  %v31_v19 = vld [vmem:[%s619_s0 + $0x18] sm:$0xff]  ;;  %v59_v20 = vsel %vm37_vm0, %v35_v18, 0.0  ;;  %v144_v22 = vsel %vm37_vm0, %v35_v18, -inf  ;;  %444 = vmatprep.subr.mxu1 %v490_v24 }
   0x8   :  { %42 = vadd.xlane.f32.xlu0 %v41_v7  ;;  %v44_v15 = vsel %vm37_vm0, %v30_v13, 0.0  ;;  %v129_v17 = vsel %vm37_vm0, %v30_v13, -inf  ;;  %v47_v21 = vsel %vm37_vm0, %v31_v19, 0.0  ;;  %v132_v23 = vsel %vm37_vm0, %v31_v19, -inf  ;;  %26 = vst.msk [vmem:[#allocation2] sm:$0x3] %vm25_vm1, %v490_v24 }
   0x9   :  { %27 = vst.msk [vmem:[#allocation3] sm:$0x3] %vm25_vm1, %v491_v25  ;;  %v204_v27 = vld [vmem:[%s620_s1 + $0x8] sm:$0xff]  ;;  %v205_v28 = vld [vmem:[%s620_s1 + $0x10] sm:$0xff]  ;;  %v492_v29 = vmov 0.0|0.0   ;;  %v206_v31 = vld [vmem:[%s620_s1 + $0x18] sm:$0xff] }
   0xa   :  { %449 = vmatprep.subr.bf16.mxu0 %v492_v29  ;;  %v450_v30 = vpack.c.bf16 %v204_v27, %v203_v26  ;;  %vm493_vm2 = vmmov 0   ;;  %v453_v32 = vpack.c.bf16 %v206_v31, %v205_v28  ;;  %v71_v40 = vand.u32 127, %v70_v37  ;;  %s494_s20 = smov [#allocation4]  }
   0xb   :  { %127 = vmax.xlane.f32.xlu1 %v126_v8  ;;  %441 = vmatprep.mubr.msk.f32.mxu0 %vm493_vm2, %v490_v24  ;;  %v73_v44 = vshrl.u32 %v70_v37, 7  ;;  %vm81_vm3 = vcmask 130112   ;;  %vm88_vm4 = vcmask 195712   ;;  %vm95_vm5 = vcmask 261312   ;;  %s412_s21 = sshll.u32 %s494_s20, 4  ;;  %s413_s21 = int_to_ptr.vmem [resolvable:$true] %s412_s21 }
   0xc   :  { %124 = vmax.xlane.f32.xlu0 %v123_v9  ;;  %446 = vmatprep.mubr.msk.f32.mxu1 %vm493_vm2, %v490_v24  ;;  %v76_v41 = vadd.s32 4294967288, %v71_v40  ;;  %v83_v45 = vadd.s32 4294967280, %v71_v40  ;;  %v90_v49 = vadd.s32 4294967272, %v71_v40  ;;  %vm116_vm6 = vcmask 1041409   ;;  %s466_s22 = scalar_lea.vmem %s413_s21, 32  ;;  %p471_p1 = scmp.lt.s32.totalorder %s413_s21, %s413_s21 }
   0xd   :  { %451 = vmatpush3.bf16.msra.mxu0 %v450_v30  ;;  %v74_v50 = vsub.s32 %v71_v40, %v73_v44  ;;  %vm211_vm7 = vcmask 1041408   ;;  %vm213_vm8 = vcmask 261120   ;;  %vm288_vm9 = vcmask 15360   ;;  %p467_p0 = scmp.ne.s32.totalorder %s413_s21, %s466_s22  ;;  %p472_p2 = scmp.lt.s32.totalorder %s466_s22, %s466_s22 }
   0xe   :  { %452 = vmatprep.subr.bf16.mxu0 %v492_v29  ;;  %v79_v46 = vsub.s32 %v76_v41, %v73_v44  ;;  %v86_v51 = vsub.s32 %v83_v45, %v73_v44  ;;  %v93_v56 = vsub.s32 %v90_v49, %v73_v44 }
   0xf   :  { %139 = vmax.xlane.f32.xlu1 %v138_v10  ;;  %p473_p3 = por %p472_p2, %p471_p1 }
  0x10   :  { %136 = vmax.xlane.f32.xlu0 %v135_v11  ;;  %v36_v11 = vld [vmem:[#allocation2] sm:$0x3]  ;;  %v122_v24 = vld [vmem:[#allocation3] sm:$0x3] }
  0x11   :  { %454 = vmatpush3.bf16.msra.mxu0 %v453_v32  ;;  %p474_p4 = pnand %p473_p3, %p467_p0 }
  0x13   :  { %57 = vadd.xlane.f32.xlu1 %v56_v14 }
  0x14   :  { %45 = vadd.xlane.f32.xlu0 %v44_v15 }
  0x17   :  { %142 = vmax.xlane.f32.xlu1 %v141_v16 }
  0x18   :  { %130 = vmax.xlane.f32.xlu0 %v129_v17 }
  0x1b   :  { %60 = vadd.xlane.f32.xlu1 %v59_v20 }
  0x1c   :  { %48 = vadd.xlane.f32.xlu0 %v47_v21 }
  0x1f   :  { %145 = vmax.xlane.f32.xlu1 %v144_v22 }
  0x20   :  { %133 = vmax.xlane.f32.xlu0 %v132_v23 }
  0x90   :  { %v52_v33 = vpop.xlane.xlu1 %51 }
  0x91   :  { %v40_v34 = vpop.xlane.xlu0 %39  ;;  %v100_v57 = vrot.slane %v52_v33, %v74_v50 }
  0x92   :  { %v75_v58 = vrot.slane %v40_v34, %v74_v50  ;;  %v207_v34 = vld [vmem:[%s621_s2] sm:$0x3] }
  0x93   :  { %445 = vmatpush3.msk.msra.mxu1 %vm211_vm7, %v207_v34 }
  0x94   :  { %v55_v35 = vpop.xlane.xlu1 %54 }
  0x95   :  { %v43_v36 = vpop.xlane.xlu0 %42  ;;  %v104_v52 = vrot.slane %v55_v35, %v79_v46 }
  0x96   :  { %v80_v53 = vrot.slane %v43_v36, %v79_v46 }
  0x97   :  { %v105_v61 = vsel %vm81_vm3, %v104_v52, %v100_v57  ;;  %v423_v52 = vld [vmem:[%s622_s3] ss:$0 sm:$0xff] }
  0x98   :  { %v128_v38 = vpop.xlane.xlu1 %127  ;;  %v82_v62 = vsel %vm81_vm3, %v80_v53, %v75_v58 }
  0x99   :  { %v125_v39 = vpop.xlane.xlu0 %124  ;;  %v162_v63 = vrot.slane %v128_v38, %v79_v46 }
  0x9a   :  { %v158_v0 = vrot.slane %v125_v39, %v74_v50 }
  0x9c   :  { %v140_v42 = vpop.xlane.xlu1 %139  ;;  %v163_v14 = vsel %vm81_vm3, %v162_v63, %v158_v0 }
  0x9d   :  { %v137_v43 = vpop.xlane.xlu0 %136  ;;  %v181_v3 = vrot.slane %v140_v42, %v79_v46 }
  0x9e   :  { %v177_v4 = vrot.slane %v137_v43, %v74_v50 }
  0xa0   :  { %v58_v47 = vpop.xlane.xlu1 %57  ;;  %v182_v18 = vsel %vm81_vm3, %v181_v3, %v177_v4 }
  0xa1   :  { %v46_v48 = vpop.xlane.xlu0 %45  ;;  %v109_v59 = vrot.slane %v58_v47, %v86_v51 }
  0xa2   :  { %v87_v60 = vrot.slane %v46_v48, %v86_v51 }
  0xa3   :  { %v110_v7 = vsel %vm88_vm4, %v109_v59, %v105_v61 }
  0xa4   :  { %v143_v54 = vpop.xlane.xlu1 %142  ;;  %v89_v8 = vsel %vm88_vm4, %v87_v60, %v82_v62 }
  0xa5   :  { %v131_v55 = vpop.xlane.xlu0 %130  ;;  %v186_v9 = vrot.slane %v143_v54, %v86_v51  ;;  %v424_v54 = vld [vmem:[%s623_s4] ss:$0 sm:$0xff] }
  0xa6   :  { %v167_v10 = vrot.slane %v131_v55, %v86_v51 }
  0xa7   :  { %v187_v22 = vsel %vm88_vm4, %v186_v9, %v182_v18 }
  0xa8   :  { %v61_v1 = vpop.xlane.xlu1 %60  ;;  %v168_v23 = vsel %vm88_vm4, %v167_v10, %v163_v14 }
  0xa9   :  { %v49_v2 = vpop.xlane.xlu0 %48  ;;  %v114_v5 = vrot.slane %v61_v1, %v93_v56 }
  0xaa   :  { %v94_v6 = vrot.slane %v49_v2, %v93_v56 }
  0xab   :  { %v115_v12 = vsel %vm95_vm5, %v114_v5, %v110_v7 }
  0xac   :  { %v96_v13 = vsel %vm95_vm5, %v94_v6, %v89_v8  ;;  %v146_v16 = vpop.xlane.xlu1 %145 }
  0xad   :  { %v117_v15 = vsel %vm116_vm6, %v115_v12, %v96_v13  ;;  %v134_v17 = vpop.xlane.xlu0 %133  ;;  %v191_v19 = vrot.slane %v146_v16, %v93_v56 }
  0xae   :  { %v172_v20 = vrot.slane %v134_v17, %v93_v56  ;;  %v119_v21 = vadd.f32 %v117_v15, %v36_v11 }
  0xaf   :  { %v192_v25 = vsel %vm95_vm5, %v191_v19, %v187_v22 }
  0xb0   :  { %v173_v26 = vsel %vm95_vm5, %v172_v20, %v168_v23  ;;  %121 = vst.msk [vmem:[#allocation2] sm:$0x3] %vm25_vm1, %v119_v21 }
  0xb1   :  { %v193_v27 = vsel %vm116_vm6, %v192_v25, %v173_v26 }
  0xb2   :  { %v195_v28 = vmax.f32 %v122_v24, %v193_v27 }
  0xb4   :  { %196 = vst.msk [vmem:[#allocation3] sm:$0x3] %vm25_vm1, %v195_v28 }
  0xb7   :  { %v200_v29 = vld [vmem:[#allocation2] sm:$0x3] }
  0xb8   :  { %v201_v31 = vmul.f32 0.0625, %v200_v29 }
  0xbb   :  { %v202_v30 = vld [vmem:[#allocation3] sm:$0x3] }
  0xbc   :  { %v209_v32 = vrot.slane %v202_v30, 6 }
  0xbe   :  { %v212_v33 = vsel %vm211_vm7, %v201_v31, %v209_v32 }
  0xbf   :  { %442 = vmatmul.mubr.msk.f32.vlgmr.msra.gmra.mrb[0].mxu0 %vm213_vm8, %v212_v33 }
 0x192   :  { %v283_v35 = vpop.f32.mrb[0].mxu0 }
 0x193   :  { %v287_v36 = vmax.f32 %v283_v35, 0.0  ;;  %v443_v37 = vpop.f32.mrb[1].mxu0 }
 0x195   :  { %447 = vmatmul.mubr.msk.f32.vlgmr.msra.gmra.mrb[0].mxu1 %vm288_vm9, %v287_v36 }
 0x268   :  { %v361_v38 = vpop.f32.mrb[0].mxu1 }
 0x269   :  { %v366_v39 = vrot.slane %v361_v38, 2  ;;  %v448_v40 = vpop.f32.mrb[1].mxu1 }
 0x26b   :  { %v368_v41 = vadd.f32 %v366_v39, %v361_v38 }
 0x26d   :  { %v369_v42 = vsel %vm25_vm1, %v368_v41, 0.0 }
 0x26e   :  { %370 = vadd.xlane.f32.xlu0 %v369_v42 }
 0x2fb   :  { %v371_v43 = vpop.xlane.xlu0 %370 }
 0x2fc   :  { %v373_v44 = vmul.f32 0.03125, %v371_v43 }
 0x2fe   :  { %v374_v45 = vsub.f32 %v368_v41, %v373_v44 }
 0x300   :  { %v375_v46 = vmul.f32 %v374_v45, %v374_v45 }
 0x302   :  { %v376_v47 = vsel %vm25_vm1, %v375_v46, 0.0 }
 0x303   :  { %377 = vadd.xlane.f32.xlu1 %v376_v47 }
 0x390   :  { %v378_v48 = vpop.xlane.xlu1 %377 }
 0x391   :  { %v379_v49 = vmul.f32 0.03125, %v378_v48 }
 0x393   :  { %v380_v50 = vadd.f32 1e-05, %v379_v49 }
 0x395   :  { %460 = vrsqrt.f32 %v380_v50 }
 0x39f   :  { %v461_v51 = vpop.eup %460 }
 0x3a0   :  { %v382_v53 = vmul.f32 %v461_v51, %v374_v45 }
 0x3a2   :  { %v390_v55 = vmul.f32 %v423_v52, %v382_v53 }
 0x3a4   :  { %v398_v56 = vadd.f32 %v424_v54, %v390_v55 }
 0x3a6   :  { %v425_v57 = vmul.f32 -1.442695, %v398_v56 }
 0x3a8   :  { %462 = vpow2.f32 %v425_v57 }
 0x3b2   :  { %v463_v58 = vpop.eup %462 }
 0x3b3   :  { %v402_v59 = vadd.f32 1.0, %v463_v58 }
 0x3b5   :  { %464 = vrcp.f32 %v402_v59 }
 0x3bf   :  { %v465_v60 = vpop.eup %464 }
 0x3c0   :  { %405 = vst.msk [vmem:[#allocation4] sm:$0x3] %vm25_vm1, %v465_v60 }
 0x3c1   :  { %477 = shalt.err (!%p474_p4)
}
 0x3c2   :  { %s478_s23 = scalar_lea.hbm %s624_s5, 32 }
 0x3c3   :  { %p479_p5 = scmp.ne.s32.totalorder %s624_s5, %s478_s23  ;;  %p482_p6 = scmp.lt.u32.totalorder %s478_s23, %s624_s5 }
 0x3c5   :  { %p484_p7 = pnand %p482_p6, %p479_p5 }
 0x3c7   :  { %487 = shalt.err (!%p484_p7)
}
 0x3c8   :  { %415 = dma.vmem_to_hbm [thread:$0]  %s413_s21, 32, %s624_s5, [#allocation5]  }
 0x3c9   :  { %488 = dma.done.wait [#allocation5], 32  }
 0x3ca   :  { %489 = vsyncadd [#allocation5], 4294967264 }
 0x3cb   :  { %419 = vsyncpa [#allocation5], 1 }

</bundles_post_ra>
